<compile_context>
chip_gen: v7x
topology: tpu7x:2x2x1
jax: 0.10.0
libtpu: 0.0.40
codegen_flags: <defaults>
</compile_context>

<pallas_src>
import functools

import jax
import jax.numpy as jnp
from jax.experimental import pallas as pl
from jax.experimental.pallas import tpu as pltpu


def _spatial_mlp_kernel(x_ref, w_ref, o_ref, *, num_heads, head_dim):
    # x_ref: (Bt, n, C)   Bt batch rows, all tokens, all channels (C = H * d)
    # w_ref: (H, n, n)    resident weight, w[h, n, m]
    # o_ref: (Bt, n, C)
    bt = x_ref.shape[0]
    H, d = num_heads, head_dim

    def row(b, carry):
        # Per-row load from the ref keeps live ranges bounded across the head loop.
        x_b = x_ref[b]                                 # (n, C)
        parts = []
        for h in range(H):                             # H is small & static -> unrolled
            lo = h * d
            # out[m, c] = sum_n w[h, n, m] * x[b, n, h*d + c]
            # Contract axis 0 of w_h against axis 0 of x_bh directly (no transpose).
            o_h = jax.lax.dot_general(
                w_ref[h], x_b[:, lo:lo + d],
                dimension_numbers=(((0,), (0,)), ((), ())),
                preferred_element_type=jnp.float32,
            )                                          # (n, d) fp32
            parts.append(o_h)
        out_b = parts[0] if H == 1 else jnp.concatenate(parts, axis=-1)   # (n, C)
        # Single lane-dense store per batch row; cast once here.
        o_ref[b] = out_b.astype(o_ref.dtype)
        return carry

    jax.lax.fori_loop(0, bt, row, 0, unroll=min(bt, 4))


def spatial_mlp(x, weight, num_heads=1, mode="linear", compute_dtype=jnp.bfloat16):
    """Pallas implementation of SpatialMLP.forward for relative=False,
    pre_proj=None, post_proj=None (the module defaults).

    compute_dtype: MXU input dtype (fp32 accumulation and original-dtype output are
    kept). bf16 is the default -- it halves HBM/VMEM traffic and is the native MXU
    input on v5e/v6e/v7x. Pass jnp.float32 (or None) for full-precision inputs.
    """
    B, n, C = x.shape
    H = num_heads
    assert C % H == 0
    d = C // H
    assert weight.shape == (H, n, n)

    # Mode handling is cheap parameter preprocessing (not the hot path) -> plain JAX.
    if mode == "softmax":
        weight = jax.nn.softmax(weight, axis=1)               # torch.softmax(w, dim=1)
    elif mode == "normalize":
        norm = jnp.sqrt(jnp.sum(weight * weight, axis=1, keepdims=True))
        weight = weight / jnp.maximum(norm, 1e-12)            # F.normalize(w, dim=1)
    elif mode == "linear":
        pass
    else:
        raise NotImplementedError(mode)

    out_dtype = x.dtype
    if compute_dtype is not None:
        x_in = x.astype(compute_dtype)
        w_in = weight.astype(compute_dtype)
    else:
        x_in, w_in = x, weight

    isz_x = jnp.dtype(x_in.dtype).itemsize
    isz_w = jnp.dtype(w_in.dtype).itemsize
    isz_o = jnp.dtype(out_dtype).itemsize

    # --- Batch tiling: target a few-MiB x block, Bt | B, >= 2 grid steps when B >= 2
    # (so the "parallel" axis can be split across v7x's two TensorCores). ---
    target_block_bytes = 4 * 1024 * 1024
    row_bytes = max(n * C * isz_x, 1)
    bt = max(1, min(B, target_block_bytes // row_bytes))
    if B >= 2:
        bt = min(bt, max(B // 2, 1))
    while B % bt:
        bt -= 1
    grid_b = B // bt

    # --- Per-generation VMEM budget with ~25% headroom (48 MiB v7x, 96 MiB v5e/v6e). ---
    try:
        vmem_cap = int(pltpu.get_tpu_info().vmem_capacity_bytes)
    except Exception:
        vmem_cap = 128 * 1024 * 1024
    vmem_budget = (vmem_cap * 3) // 4

    flops = 2 * B * n * n * C
    bytes_accessed = int(B * n * C * (isz_x + isz_o) + H * n * n * isz_w)

    def build(single_buffer_weight):
        w_bufs = 1 if single_buffer_weight else 2
        vmem_est = (
            2 * bt * n * C * isz_x          # x blocks, double-buffered
            + 2 * bt * n * C * isz_o        # out blocks, double-buffered (output dtype)
            + w_bufs * H * n * n * isz_w    # resident weight
            + 4 * n * C * 4                 # fp32 per-row matmul/concat temporaries
        )
        vmem_limit = int(min(max(vmem_est, 16 * 1024 * 1024), vmem_budget))

        if single_buffer_weight:
            # Constant index_map -> block is revisited every step and never needs
            # double buffering; Buffered(1) halves its resident VMEM footprint.
            w_spec = pl.BlockSpec((H, n, n), lambda b: (0, 0, 0),
                                  pipeline_mode=pl.Buffered(1))
        else:
            w_spec = pl.BlockSpec((H, n, n), lambda b: (0, 0, 0))

        return pl.pallas_call(
            functools.partial(_spatial_mlp_kernel, num_heads=H, head_dim=d),
            out_shape=jax.ShapeDtypeStruct((B, n, C), out_dtype),
            grid_spec=pltpu.PrefetchScalarGridSpec(
                num_scalar_prefetch=0,
                grid=(grid_b,),
                in_specs=[
                    pl.BlockSpec((bt, n, C), lambda b: (b, 0, 0)),
                    w_spec,
                ],
                out_specs=pl.BlockSpec((bt, n, C), lambda b: (b, 0, 0)),
            ),
            compiler_params=pltpu.CompilerParams(
                dimension_semantics=("parallel",),
                vmem_limit_bytes=vmem_limit,
            ),
            cost_estimate=pl.CostEstimate(
                flops=flops,
                transcendentals=0,
                bytes_accessed=bytes_accessed,
            ),
        )

    try:
        out = build(True)(x_in, w_in)
    except Exception:
        # Fallback for JAX versions where Buffered(1) isn't supported on this path:
        # identical semantics, default double-buffered weight block.
        out = build(False)(x_in, w_in)

    # TODO(synk): reference reshapes to (B, n, C // self.squeeze) but `self.squeeze`
    # is never defined in __init__; assuming squeeze == 1, i.e. output (B, n, C).
    # TODO(synk): relative=True (relative_position_index gather) and pre/post_proj
    # Linear layers are not implemented (module defaults leave them disabled).
    # TODO(synk): for d = C/H < 128 each per-head dot has MXU N = d (<128 lanes);
    # widening N via a head-batched (H, n, Bt*d) layout needs two in-kernel relayouts
    # per block -- left out as shape-dependent tuning (neutral/negative for the
    # memory-bound small-n regime).
    return out


if __name__ == "__main__":
    key = jax.random.PRNGKey(0)
    B, n, C, H = 2, 64, 32, 2          # small shapes consistent with the module
    kx, kw = jax.random.split(key)

    # Deterministic "parameter" init, mirroring torch.randn(...) * 0.02
    x = jax.random.normal(kx, (B, n, C), dtype=jnp.float32)
    weight = jax.random.normal(kw, (H, n, n), dtype=jnp.float32) * 0.02

    # Pure-JAX reference of the same forward pass
    ref = jnp.einsum(
        "bnhc,hnm->bmhc", x.reshape(B, n, H, C // H), weight
    ).reshape(B, n, C)

    # Full-precision path: tight tolerance vs the fp32 reference.
    out_f32 = jax.block_until_ready(
        spatial_mlp(x, weight, num_heads=H, mode="linear",
                    compute_dtype=jnp.float32))
    assert out_f32.shape == (B, n, C)
    assert jnp.allclose(out_f32, ref, atol=1e-4, rtol=1e-4), "fp32 mismatch vs reference"

    # Default (bf16 MXU inputs, fp32 accumulation, fp32 output) path.
    out_bf16 = jax.block_until_ready(spatial_mlp(x, weight, num_heads=H, mode="linear"))
    assert out_bf16.shape == (B, n, C)
    assert out_bf16.dtype == x.dtype
    assert jnp.allclose(out_bf16, ref, atol=5e-2, rtol=5e-2), "bf16 mismatch vs reference"

    print("KERNEL_OK")
</pallas_src>

<mosaic_0001>
module attributes {stable_mosaic.version = 11 : i64} {
  func.func @_spatial_mlp_kernel(%arg0: i32, %arg1: memref<1x64x32xf32, #tpu.memory_space<vmem>>, %arg2: memref<2x64x64xf32, #tpu.memory_space<vmem>>, %arg3: memref<1x64x32xf32, #tpu.memory_space<vmem>>) attributes {dimension_semantics = [#tpu.dimension_semantics<parallel>], iteration_bounds = array<i64: 2>, scalar_prefetch = 0 : i64, scratch_operands = 0 : i64, tpu.core_type = #tpu.core_type<tc>, window_params = [{transform_indices = @transform_0, window_bounds = array<i64: 1, 64, 32>}, {pipeline_mode = #tpu.pipeline_mode<synchronous>, transform_indices = @transform_1, window_bounds = array<i64: 2, 64, 64>}, {transform_indices = @transform_2, window_bounds = array<i64: 1, 64, 32>}]} {
    %c0_i32 = arith.constant 0 : i32
    %0 = arith.index_cast %c0_i32 : i32 to index
    %c0 = arith.constant 0 : index
    %c0_0 = arith.constant 0 : index
    %1 = vector.load %arg1[%0, %c0, %c0_0] : memref<1x64x32xf32, #tpu.memory_space<vmem>>, vector<1x64x32xf32>
    %2 = vector.shape_cast %1 : vector<1x64x32xf32> to vector<64x32xf32>
    %c0_1 = arith.constant 0 : index
    %c0_2 = arith.constant 0 : index
    %c0_3 = arith.constant 0 : index
    %3 = vector.load %arg2[%c0_1, %c0_2, %c0_3] : memref<2x64x64xf32, #tpu.memory_space<vmem>>, vector<1x64x64xf32>
    %4 = vector.shape_cast %3 : vector<1x64x64xf32> to vector<64x64xf32>
    %5 = vector.extract_strided_slice %2 {offsets = [0, 0], sizes = [64, 16], strides = [1, 1]} : vector<64x32xf32> to vector<64x16xf32>
    %cst = arith.constant dense<0.000000e+00> : vector<64x16xf32>
    %6 = tpu.matmul %4, %5, %cst {dimension_numbers = #tpu.dot_dimension_numbers<[0], [0], [1], [1], [0, 1, 1, 1], [], []>} : vector<64x64xf32>, vector<64x16xf32>, vector<64x16xf32> -> vector<64x16xf32>
    %c1 = arith.constant 1 : index
    %c0_4 = arith.constant 0 : index
    %c0_5 = arith.constant 0 : index
    %7 = vector.load %arg2[%c1, %c0_4, %c0_5] : memref<2x64x64xf32, #tpu.memory_space<vmem>>, vector<1x64x64xf32>
    %8 = vector.shape_cast %7 : vector<1x64x64xf32> to vector<64x64xf32>
    %9 = vector.extract_strided_slice %2 {offsets = [0, 16], sizes = [64, 16], strides = [1, 1]} : vector<64x32xf32> to vector<64x16xf32>
    %cst_6 = arith.constant dense<0.000000e+00> : vector<64x16xf32>
    %10 = tpu.matmul %8, %9, %cst_6 {dimension_numbers = #tpu.dot_dimension_numbers<[0], [0], [1], [1], [0, 1, 1, 1], [], []>} : vector<64x64xf32>, vector<64x16xf32>, vector<64x16xf32> -> vector<64x16xf32>
    %11 = tpu.concatenate %6, %10 in 1 : vector<64x16xf32>, vector<64x16xf32> -> vector<64x32xf32>
    %12 = arith.index_cast %c0_i32 : i32 to index
    %c0_7 = arith.constant 0 : index
    %c0_8 = arith.constant 0 : index
    %13 = vector.load %arg3[%12, %c0_7, %c0_8] : memref<1x64x32xf32, #tpu.memory_space<vmem>>, vector<1x64x32xf32>
    %14 = vector.shape_cast %13 : vector<1x64x32xf32> to vector<64x32xf32>
    %15 = vector.shape_cast %11 : vector<64x32xf32> to vector<1x64x32xf32>
    tpu.vector_store %arg3[%12, %c0_7, %c0_8], %15 {strides = array<i32>} : memref<1x64x32xf32, #tpu.memory_space<vmem>>, vector<1x64x32xf32>,
    %c1_i32 = arith.constant 1 : i32
    return
  }
  func.func @transform_0(%arg0: i32) -> (i32, i32, i32) {
    %c0_i32 = arith.constant 0 : i32
    %c0_i32_0 = arith.constant 0 : i32
    %c0_i32_1 = arith.constant 0 : i32
    return %arg0, %c0_i32, %c0_i32_0 : i32, i32, i32
  }
  func.func @transform_1(%arg0: i32) -> (i32, i32, i32) {
    %c0_i32 = arith.constant 0 : i32
    %c0_i32_0 = arith.constant 0 : i32
    %c0_i32_1 = arith.constant 0 : i32
    %c0_i32_2 = arith.constant 0 : i32
    return %c0_i32, %c0_i32_0, %c0_i32_1 : i32, i32, i32
  }
  func.func @transform_2(%arg0: i32) -> (i32, i32, i32) {
    %c0_i32 = arith.constant 0 : i32
    %c0_i32_0 = arith.constant 0 : i32
    %c0_i32_1 = arith.constant 0 : i32
    return %arg0, %c0_i32, %c0_i32_0 : i32, i32, i32
  }
}

module attributes {stable_mosaic.version = 11 : i64} {
  func.func @_spatial_mlp_kernel(%arg0: i32, %arg1: memref<1x64x32xf32, #tpu.memory_space<vmem>>, %arg2: memref<2x64x64xf32, #tpu.memory_space<vmem>>, %arg3: memref<1x64x32xf32, #tpu.memory_space<vmem>>) attributes {dimension_semantics = [#tpu.dimension_semantics<parallel>], iteration_bounds = array<i64: 2>, scalar_prefetch = 0 : i64, scratch_operands = 0 : i64, tpu.core_type = #tpu.core_type<tc>, window_params = [{transform_indices = @transform_0, window_bounds = array<i64: 1, 64, 32>}, {pipeline_mode = #tpu.pipeline_mode<synchronous>, transform_indices = @transform_1, window_bounds = array<i64: 2, 64, 64>}, {transform_indices = @transform_2, window_bounds = array<i64: 1, 64, 32>}]} {
    %c0_i32 = arith.constant 0 : i32
    %0 = arith.index_cast %c0_i32 : i32 to index
    %c0 = arith.constant 0 : index
    %c0_0 = arith.constant 0 : index
    %1 = vector.load %arg1[%0, %c0, %c0_0] : memref<1x64x32xf32, #tpu.memory_space<vmem>>, vector<1x64x32xf32>
    %2 = vector.shape_cast %1 : vector<1x64x32xf32> to vector<64x32xf32>
    %c0_1 = arith.constant 0 : index
    %c0_2 = arith.constant 0 : index
    %c0_3 = arith.constant 0 : index
    %3 = vector.load %arg2[%c0_1, %c0_2, %c0_3] : memref<2x64x64xf32, #tpu.memory_space<vmem>>, vector<1x64x64xf32>
    %4 = vector.shape_cast %3 : vector<1x64x64xf32> to vector<64x64xf32>
    %5 = vector.extract_strided_slice %2 {offsets = [0, 0], sizes = [64, 16], strides = [1, 1]} : vector<64x32xf32> to vector<64x16xf32>
    %cst = arith.constant dense<0.000000e+00> : vector<64x16xf32>
    %6 = tpu.matmul %4, %5, %cst {dimension_numbers = #tpu.dot_dimension_numbers<[0], [0], [1], [1], [0, 1, 1, 1], [], []>} : vector<64x64xf32>, vector<64x16xf32>, vector<64x16xf32> -> vector<64x16xf32>
    %c1 = arith.constant 1 : index
    %c0_4 = arith.constant 0 : index
    %c0_5 = arith.constant 0 : index
    %7 = vector.load %arg2[%c1, %c0_4, %c0_5] : memref<2x64x64xf32, #tpu.memory_space<vmem>>, vector<1x64x64xf32>
    %8 = vector.shape_cast %7 : vector<1x64x64xf32> to vector<64x64xf32>
    %9 = vector.extract_strided_slice %2 {offsets = [0, 16], sizes = [64, 16], strides = [1, 1]} : vector<64x32xf32> to vector<64x16xf32>
    %cst_6 = arith.constant dense<0.000000e+00> : vector<64x16xf32>
    %10 = tpu.matmul %8, %9, %cst_6 {dimension_numbers = #tpu.dot_dimension_numbers<[0], [0], [1], [1], [0, 1, 1, 1], [], []>} : vector<64x64xf32>, vector<64x16xf32>, vector<64x16xf32> -> vector<64x16xf32>
    %11 = tpu.concatenate %6, %10 in 1 : vector<64x16xf32>, vector<64x16xf32> -> vector<64x32xf32>
    %12 = arith.index_cast %c0_i32 : i32 to index
    %c0_7 = arith.constant 0 : index
    %c0_8 = arith.constant 0 : index
    %13 = vector.load %arg3[%12, %c0_7, %c0_8] : memref<1x64x32xf32, #tpu.memory_space<vmem>>, vector<1x64x32xf32>
    %14 = vector.shape_cast %13 : vector<1x64x32xf32> to vector<64x32xf32>
    %15 = vector.shape_cast %11 : vector<64x32xf32> to vector<1x64x32xf32>
    tpu.vector_store %arg3[%12, %c0_7, %c0_8], %15 {strides = array<i32>} : memref<1x64x32xf32, #tpu.memory_space<vmem>>, vector<1x64x32xf32>,
    %c1_i32 = arith.constant 1 : i32
    return
  }
  func.func @transform_0(%arg0: i32) -> (i32, i32, i32) {
    %c0_i32 = arith.constant 0 : i32
    %c0_i32_0 = arith.constant 0 : i32
    %c0_i32_1 = arith.constant 0 : i32
    return %arg0, %c0_i32, %c0_i32_0 : i32, i32, i32
  }
  func.func @transform_1(%arg0: i32) -> (i32, i32, i32) {
    %c0_i32 = arith.constant 0 : i32
    %c0_i32_0 = arith.constant 0 : i32
    %c0_i32_1 = arith.constant 0 : i32
    %c0_i32_2 = arith.constant 0 : i32
    return %c0_i32, %c0_i32_0, %c0_i32_1 : i32, i32, i32
  }
  func.func @transform_2(%arg0: i32) -> (i32, i32, i32) {
    %c0_i32 = arith.constant 0 : i32
    %c0_i32_0 = arith.constant 0 : i32
    %c0_i32_1 = arith.constant 0 : i32
    return %arg0, %c0_i32, %c0_i32_0 : i32, i32, i32
  }
}

</mosaic_0001>

<bundles_post_ra>
// kernel: tpu_custom_call.1
= control target key start
LH: loop header
LB: loop body
LE: loop exit
PB: predicated region body
PF: predicated region fallthrough
CT: control target
= control target key end

     0   :  { %s842_s9 = smov 0   ;;  %s946_s0 = inlined_call_operand.vmem [shape: f32[2,64,32], index: 0, kind: input, shape index: {}]   ;;  %s947_s1 = inlined_call_operand.vmem [shape: f32[2,64,64], index: 1, kind: input, shape index: {}]   ;;  %s948_s2 = inlined_call_operand.vmem [shape: f32[2,64,32], index: 2, kind: output, shape index: {}]  }
   0x1 LB: > { %s629_s10 = sadd.s32 4294967295, %s823_s9   ;;  %p633_p0 = scmp.ge.s32.totalorder %s823_s9, 1  ;;  %s823_s9 = sphi %s842_s9, %s12_s9  }
   0x2   : > { %p112_p1 = scmp.lt.s32.totalorder %s823_s9, 3 }
   0x4   : > { %p113_p2 = pnand %p633_p0, %p112_p1 }
   0x5   : > { %p134_p3 = scmp.lt.s32.totalorder (!%p113_p2), %s629_s10, 1  ;;  %s825_s15 = smov (!%p113_p2), 112   ;;  %v646_v13 = vld [vmem:[%s947_s1 + $0x40] sm:$0xff] (!%p113_p2)  ;;  %v647_v14 = vld [vmem:[%s947_s1 + $0x48] sm:$0xff] (!%p113_p2)  ;;  %v648_v15 = vld [vmem:[%s947_s1 + $0x50] sm:$0xff] (!%p113_p2)  ;;  %vm192_vm0 = vcmask (!%p113_p2), 523264  }
   0x6   : > { %116 = sbr.rel (%p113_p2) target bundleno = 540 (0x21c), region = 28  ;;  %v649_v16 = vld [vmem:[%s947_s1 + $0x58] sm:$0xff] (!%p113_p2)  ;;  %v152_v17 = vld [vmem:[%s947_s1] sm:$0xff] (!%p113_p2)  ;;  %v153_v19 = vld [vmem:[%s947_s1 + $0x8] sm:$0xff] (!%p113_p2)  ;;  %s826_s23 = smov (!%p113_p2), 16   ;;  %vm556_vm1 = vcmask (!%p113_p2), 130048  }
   0x7   : > { %v650_v18 = vld [vmem:[%s947_s1 + $0x60] sm:$0xff] (!%p113_p2)  ;;  %v651_v20 = vld [vmem:[%s947_s1 + $0x68] sm:$0xff] (!%p113_p2)  ;;  %v154_v21 = vld [vmem:[%s947_s1 + $0x10] sm:$0xff] (!%p113_p2)  ;;  %vm565_vm2 = vcmask (!%p113_p2), 261120  }
   0x8   : > { %v652_v22 = vld [vmem:[%s947_s1 + $0x70] sm:$0xff] (!%p113_p2)  ;;  %v155_v23 = vld [vmem:[%s947_s1 + $0x18] sm:$0xff] (!%p113_p2)  ;;  %v156_v25 = vld [vmem:[%s947_s1 + $0x20] sm:$0xff] (!%p113_p2) }
   0x9   : > { %v653_v24 = vld [vmem:[%s947_s1 + $0x78] sm:$0xff] (!%p113_p2)  ;;  %v157_v26 = vld [vmem:[%s947_s1 + $0x28] sm:$0xff] (!%p113_p2)  ;;  %v158_v30 = vld [vmem:[%s947_s1 + $0x30] sm:$0xff] (!%p113_p2) }
   0xa   : > { %v159_v31 = vld [vmem:[%s947_s1 + $0x38] sm:$0xff] (!%p113_p2) }
   0xd   : > { %s950_s10 = smov (!%p134_p3, %s629_s10), 1 }
   0xe   : > { %s664_s11 = sshll.u32 %s950_s10, 6 }
   0xf   : > { %s138_s14 = scalar_lea.vmem %s946_s0, %s664_s11  ;;  %s143_s26 = scalar_lea.vmem %s948_s2, %s664_s11 }
  0x10   : > { %v144_v0 = vld [vmem:[%s138_s14] sm:$0xff]  ;;  %v145_v1 = vld [vmem:[%s138_s14 + $0x8] sm:$0xff]  ;;  %v146_v2 = vld [vmem:[%s138_s14 + $0x10] sm:$0xff] }
  0x11   : > { %v797_v3 = vpack.i.bf16 %v145_v1, %v144_v0  ;;  %v147_v4 = vld [vmem:[%s138_s14 + $0x18] sm:$0xff]  ;;  %v148_v5 = vld [vmem:[%s138_s14 + $0x20] sm:$0xff]  ;;  %v149_v6 = vld [vmem:[%s138_s14 + $0x28] sm:$0xff]  ;;  %v754_v27 = vpack.c.bf16 %v145_v1, %v144_v0 }
  0x12   : > { %v807_v7 = vpack.i.bf16 %v149_v6, %v148_v5  ;;  %v762_v8 = vpack.c.bf16 %v149_v6, %v148_v5  ;;  %v150_v9 = vld [vmem:[%s138_s14 + $0x30] sm:$0xff]  ;;  %v151_v10 = vld [vmem:[%s138_s14 + $0x38] sm:$0xff]  ;;  %v802_v11 = vpack.i.bf16 %v147_v4, %v146_v2  ;;  %v758_v28 = vpack.c.bf16 %v147_v4, %v146_v2 }
  0x13   : > { %798 = vrot.lane.b32.xlu0 %v797_v3, %s825_s15  ;;  %v812_v12 = vpack.i.bf16 %v151_v10, %v150_v9  ;;  %v766_v29 = vpack.c.bf16 %v151_v10, %v150_v9  ;;  %755 = vmatprep.subr.bf16.mxu0 %v754_v27 }
  0x14   : > { %808 = vrot.lane.b32.xlu1 %v807_v7, %s825_s15  ;;  %757 = vmatpush3.bf16.msra.mxu0 %v754_v27 }
  0x15   : > { %759 = vmatprep.subr.bf16.mxu0 %v758_v28 }
  0x17   : > { %803 = vrot.lane.b32.xlu0 %v802_v11, %s825_s15 }
  0x18   : > { %813 = vrot.lane.b32.xlu1 %v812_v12, %s825_s15  ;;  %761 = vmatpush3.bf16.msra.mxu0 %v758_v28 }
  0x19   : > { %763 = vmatprep.subr.bf16.mxu0 %v762_v8 }
  0x1c   : > { %765 = vmatpush3.bf16.msra.mxu0 %v762_v8 }
  0x1d   : > { %767 = vmatprep.subr.bf16.mxu0 %v766_v29 }
  0x20   : > { %769 = vmatpush3.bf16.msra.mxu0 %v766_v29 }
  0x35   : > { %331 = vxpose.xlu0.b32.start [1/8] (short) (narrow) %v646_v13, 64 }
  0x39   : > { %332 = vxpose.xlu0.b32.cont [2/8] (short) (narrow) %v647_v14, 64 }
  0x3d   : > { %333 = vxpose.xlu0.b32.cont [3/8] (short) (narrow) %v648_v15, 64 }
  0x41   : > { %334 = vxpose.xlu0.b32.cont [4/8] (short) (narrow) %v649_v16, 64  ;;  %160 = vxpose.xlu1.b32.start [1/8] (short) (narrow) %v152_v17, 64 }
  0x45   : > { %335 = vxpose.xlu0.b32.cont [5/8] (short) (narrow) %v650_v18, 64  ;;  %161 = vxpose.xlu1.b32.cont [2/8] (short) (narrow) %v153_v19, 64 }
  0x49   : > { %336 = vxpose.xlu0.b32.cont [6/8] (short) (narrow) %v651_v20, 64  ;;  %162 = vxpose.xlu1.b32.cont [3/8] (short) (narrow) %v154_v21, 64 }
  0x4d   : > { %337 = vxpose.xlu0.b32.cont [7/8] (short) (narrow) %v652_v22, 64  ;;  %163 = vxpose.xlu1.b32.cont [4/8] (short) (narrow) %v155_v23, 64 }
  0x51   : > { %338 = vxpose.xlu0.b32.end [8/8] (short) (narrow) %v653_v24, 64  ;;  %164 = vxpose.xlu1.b32.cont [5/8] (short) (narrow) %v156_v25, 64 }
  0x55   : > { %165 = vxpose.xlu1.b32.cont [6/8] (short) (narrow) %v157_v26, 64 }
  0x59   : > { %166 = vxpose.xlu1.b32.cont [7/8] (short) (narrow) %v158_v30, 64 }
  0x5d   : > { %167 = vxpose.xlu1.b32.end [8/8] (short) (narrow) %v159_v31, 64 }
  0x85   : > { %v799_v32 = vpop.permute.xlu0 %798 }
  0x86   : > { %v801_v33 = vunpack.i.h.bf16 %v799_v32  ;;  %v800_v34 = vunpack.i.l.bf16 %v799_v32  ;;  %v809_v35 = vpop.permute.xlu1 %808 }
  0x87   : > { %v811_v37 = vunpack.i.h.bf16 %v809_v35  ;;  %v810_v38 = vunpack.i.l.bf16 %v809_v35 }
  0x88   : > { %v770_v36 = vpack.c.bf16 %v801_v33, %v800_v34 }
  0x89   : > { %v804_v39 = vpop.permute.xlu0 %803  ;;  %v778_v44 = vpack.c.bf16 %v811_v37, %v810_v38 }
  0x8a   : > { %v806_v40 = vunpack.i.h.bf16 %v804_v39  ;;  %v805_v41 = vunpack.i.l.bf16 %v804_v39  ;;  %771 = vmatprep.subr.bf16.mxu1 %v770_v36  ;;  %v814_v42 = vpop.permute.xlu1 %813 }
  0x8b   : > { %773 = vmatpush3.bf16.msra.mxu1 %v770_v36  ;;  %v816_v45 = vunpack.i.h.bf16 %v814_v42  ;;  %v815_v46 = vunpack.i.l.bf16 %v814_v42 }
  0x8c   : > { %v774_v43 = vpack.c.bf16 %v806_v40, %v805_v41 }
  0x8d   : > { %v782_v47 = vpack.c.bf16 %v816_v45, %v815_v46 }
  0x8e   : > { %775 = vmatprep.subr.bf16.mxu1 %v774_v43 }
  0x8f   : > { %777 = vmatpush3.bf16.msra.mxu1 %v774_v43 }
  0x90   : > { %779 = vmatprep.subr.bf16.mxu1 %v778_v44 }
  0x93   : > { %781 = vmatpush3.bf16.msra.mxu1 %v778_v44 }
  0x94   : > { %783 = vmatprep.subr.bf16.mxu1 %v782_v47 }
  0x97   : > { %785 = vmatpush3.bf16.msra.mxu1 %v782_v47 }
  0xb5   : > { %v347_v48 = vpop.trf.xlu0 }
  0xb6   : > { %742 = vmatprep.mubr.msk.f32.mxu1 %vm192_vm0, %v347_v48 }
  0xb9   : > { %v348_v49 = vpop.trf.xlu0 }
  0xba   : > { %743 = vmatmul.mubr.msk.f32.vlgmr.msra.gmra.mrb[0].mxu1 %vm192_vm0, %v348_v49 }
  0xbd   : > { %v349_v50 = vpop.trf.xlu0 }
  0xbe   : > { %745 = vmatprep.mubr.msk.f32.mxu1 %vm192_vm0, %v349_v50 }
  0xc1   : > { %v350_v51 = vpop.trf.xlu0  ;;  %v176_v52 = vpop.trf.xlu1 }
  0xc2   : > { %746 = vmatmul.mubr.msk.f32.gmra.mrb[2].mxu1 %vm192_vm0, %v350_v51  ;;  %714 = vmatprep.mubr.msk.f32.mxu0 %vm192_vm0, %v176_v52 }
  0xc5   : > { %v351_v53 = vpop.trf.xlu0  ;;  %v177_v54 = vpop.trf.xlu1 }
  0xc6   : > { %748 = vmatprep.mubr.msk.f32.mxu1 %vm192_vm0, %v351_v53  ;;  %715 = vmatmul.mubr.msk.f32.vlgmr.msra.gmra.mrb[0].mxu0 %vm192_vm0, %v177_v54 }
  0xc9   : > { %v352_v55 = vpop.trf.xlu0  ;;  %v178_v56 = vpop.trf.xlu1 }
  0xca   : > { %749 = vmatmul.mubr.msk.f32.gmra.mrb[4].mxu1 %vm192_vm0, %v352_v55  ;;  %717 = vmatprep.mubr.msk.f32.mxu0 %vm192_vm0, %v178_v56 }
  0xcd   : > { %v353_v57 = vpop.trf.xlu0  ;;  %v179_v58 = vpop.trf.xlu1 }
  0xce   : > { %751 = vmatprep.mubr.msk.f32.mxu1 %vm192_vm0, %v353_v57  ;;  %718 = vmatmul.mubr.msk.f32.gmra.mrb[2].mxu0 %vm192_vm0, %v179_v58 }
  0xd1   : > { %v354_v59 = vpop.trf.xlu0  ;;  %v180_v60 = vpop.trf.xlu1 }
  0xd2   : > { %752 = vmatmul.mubr.msk.f32.gmra.mrb[6].mxu1 %vm192_vm0, %v354_v59  ;;  %720 = vmatprep.mubr.msk.f32.mxu0 %vm192_vm0, %v180_v60 }
  0xd5   : > { %v181_v61 = vpop.trf.xlu1 }
  0xd6   : > { %721 = vmatmul.mubr.msk.f32.gmra.mrb[4].mxu0 %vm192_vm0, %v181_v61 }
  0xd9   : > { %v182_v62 = vpop.trf.xlu1 }
  0xda   : > { %723 = vmatprep.mubr.msk.f32.mxu0 %vm192_vm0, %v182_v62 }
  0xdd   : > { %v183_v63 = vpop.trf.xlu1 }
  0xde   : > { %724 = vmatmul.mubr.msk.f32.gmra.mrb[6].mxu0 %vm192_vm0, %v183_v63 }
 0x18d   : > { %v744_v0 = vpop.f32.mrb[0].mxu1 }
 0x18e   : > { %534 = vrot.lane.b32.xlu1 %v744_v0, %s826_s23  ;;  %v485_v1 = vpop.f32.mrb[1].mxu1 }
 0x18f   : > { %532 = vrot.lane.b32.xlu0 %v485_v1, %s826_s23 }
 0x195   : > { %v747_v2 = vpop.f32.mrb[2].mxu1 }
 0x196   : > { %538 = vrot.lane.b32.xlu1 %v747_v2, %s826_s23  ;;  %v495_v3 = vpop.f32.mrb[3].mxu1 }
 0x197   : > { %536 = vrot.lane.b32.xlu0 %v495_v3, %s826_s23 }
 0x199   : > { %v716_v4 = vpop.f32.mrb[0].mxu0 }
 0x19a   : > { %v283_v5 = vpop.f32.mrb[1].mxu0 }
 0x19d   : > { %v750_v6 = vpop.f32.mrb[4].mxu1 }
 0x19e   : > { %542 = vrot.lane.b32.xlu1 %v750_v6, %s826_s23  ;;  %v505_v7 = vpop.f32.mrb[5].mxu1 }
 0x19f   : > { %540 = vrot.lane.b32.xlu0 %v505_v7, %s826_s23 }
 0x1a1   : > { %v719_v8 = vpop.f32.mrb[2].mxu0 }
 0x1a2   : > { %v293_v9 = vpop.f32.mrb[3].mxu0 }
 0x1a5   : > { %v753_v10 = vpop.f32.mrb[6].mxu1 }
 0x1a6   : > { %546 = vrot.lane.b32.xlu1 %v753_v10, %s826_s23  ;;  %v515_v11 = vpop.f32.mrb[7].mxu1 }
 0x1a7   : > { %544 = vrot.lane.b32.xlu0 %v515_v11, %s826_s23 }
 0x1a9   : > { %v722_v12 = vpop.f32.mrb[4].mxu0 }
 0x1aa   : > { %v303_v13 = vpop.f32.mrb[5].mxu0 }
 0x1b1   : > { %v725_v14 = vpop.f32.mrb[6].mxu0 }
 0x1b2   : > { %v313_v15 = vpop.f32.mrb[7].mxu0 }
 0x200   : > { %v535_v16 = vpop.permute.xlu1 %534 }
 0x201   : > { %v558_v17 = vsel %vm556_vm1, %v716_v4, %v535_v16  ;;  %v533_v18 = vpop.permute.xlu0 %532 }
 0x202   : > { %567 = vst.msk [vmem:[%s143_s26 + $0x8] sm:$0xff] %vm565_vm2, %v558_v17  ;;  %v557_v19 = vsel %vm556_vm1, %v283_v5, %v533_v18 }
 0x203   : > { %566 = vst.msk [vmem:[%s143_s26] sm:$0xff] %vm565_vm2, %v557_v19 }
 0x208   : > { %v539_v20 = vpop.permute.xlu1 %538 }
 0x209   : > { %v560_v21 = vsel %vm556_vm1, %v719_v8, %v539_v20  ;;  %v537_v22 = vpop.permute.xlu0 %536 }
 0x20a   : > { %569 = vst.msk [vmem:[%s143_s26 + $0x18] sm:$0xff] %vm565_vm2, %v560_v21  ;;  %v559_v23 = vsel %vm556_vm1, %v293_v9, %v537_v22 }
 0x20b   : > { %568 = vst.msk [vmem:[%s143_s26 + $0x10] sm:$0xff] %vm565_vm2, %v559_v23 }
 0x210   : > { %v543_v24 = vpop.permute.xlu1 %542 }
 0x211   : > { %v562_v25 = vsel %vm556_vm1, %v722_v12, %v543_v24  ;;  %v541_v26 = vpop.permute.xlu0 %540 }
 0x212   : > { %571 = vst.msk [vmem:[%s143_s26 + $0x28] sm:$0xff] %vm565_vm2, %v562_v25  ;;  %v561_v27 = vsel %vm556_vm1, %v303_v13, %v541_v26 }
 0x213   : > { %570 = vst.msk [vmem:[%s143_s26 + $0x20] sm:$0xff] %vm565_vm2, %v561_v27 }
 0x218   : > { %v547_v28 = vpop.permute.xlu1 %546 }
 0x219   : > { %v564_v29 = vsel %vm556_vm1, %v725_v14, %v547_v28  ;;  %v545_v30 = vpop.permute.xlu0 %544 }
 0x21a   : > { %573 = vst.msk [vmem:[%s143_s26 + $0x38] sm:$0xff] %vm565_vm2, %v564_v29  ;;  %v563_v31 = vsel %vm556_vm1, %v313_v15, %v545_v30 }
 0x21b   : > { %572 = vst.msk [vmem:[%s143_s26 + $0x30] sm:$0xff] %vm565_vm2, %v563_v31 }
 0x21c PF: > { %s12_s9 = sadd.s32 1, %s823_s9  }
 0x21d   : > { %p9_p4 = scmp.ge.s32.totalorder %s12_s9, 4  }
 0x21f   :  { %11 = sbr.rel (!%p9_p4) target bundleno = 1 (0x1), region = 59 }

// kernel: tpu_custom_call.1
= control target key start
LH: loop header
LB: loop body
LE: loop exit
PB: predicated region body
PF: predicated region fallthrough
CT: control target
= control target key end

     0   :  { %s842_s9 = smov 0   ;;  %s946_s0 = inlined_call_operand.vmem [shape: f32[2,64,32], index: 0, kind: input, shape index: {}]   ;;  %s947_s1 = inlined_call_operand.vmem [shape: f32[2,64,64], index: 1, kind: input, shape index: {}]   ;;  %s948_s2 = inlined_call_operand.vmem [shape: f32[2,64,32], index: 2, kind: output, shape index: {}]  }
   0x1 LB: > { %s629_s10 = sadd.s32 4294967295, %s823_s9   ;;  %p633_p0 = scmp.ge.s32.totalorder %s823_s9, 1  ;;  %s823_s9 = sphi %s842_s9, %s12_s9  }
   0x2   : > { %p112_p1 = scmp.lt.s32.totalorder %s823_s9, 3 }
   0x4   : > { %p113_p2 = pnand %p633_p0, %p112_p1 }
   0x5   : > { %p134_p3 = scmp.lt.s32.totalorder (!%p113_p2), %s629_s10, 1  ;;  %s825_s15 = smov (!%p113_p2), 112   ;;  %v646_v13 = vld [vmem:[%s947_s1 + $0x40] sm:$0xff] (!%p113_p2)  ;;  %v647_v14 = vld [vmem:[%s947_s1 + $0x48] sm:$0xff] (!%p113_p2)  ;;  %v648_v15 = vld [vmem:[%s947_s1 + $0x50] sm:$0xff] (!%p113_p2)  ;;  %vm192_vm0 = vcmask (!%p113_p2), 523264  }
   0x6   : > { %116 = sbr.rel (%p113_p2) target bundleno = 540 (0x21c), region = 28  ;;  %v649_v16 = vld [vmem:[%s947_s1 + $0x58] sm:$0xff] (!%p113_p2)  ;;  %v152_v17 = vld [vmem:[%s947_s1] sm:$0xff] (!%p113_p2)  ;;  %v153_v19 = vld [vmem:[%s947_s1 + $0x8] sm:$0xff] (!%p113_p2)  ;;  %s826_s23 = smov (!%p113_p2), 16   ;;  %vm556_vm1 = vcmask (!%p113_p2), 130048  }
   0x7   : > { %v650_v18 = vld [vmem:[%s947_s1 + $0x60] sm:$0xff] (!%p113_p2)  ;;  %v651_v20 = vld [vmem:[%s947_s1 + $0x68] sm:$0xff] (!%p113_p2)  ;;  %v154_v21 = vld [vmem:[%s947_s1 + $0x10] sm:$0xff] (!%p113_p2)  ;;  %vm565_vm2 = vcmask (!%p113_p2), 261120  }
   0x8   : > { %v652_v22 = vld [vmem:[%s947_s1 + $0x70] sm:$0xff] (!%p113_p2)  ;;  %v155_v23 = vld [vmem:[%s947_s1 + $0x18] sm:$0xff] (!%p113_p2)  ;;  %v156_v25 = vld [vmem:[%s947_s1 + $0x20] sm:$0xff] (!%p113_p2) }
   0x9   : > { %v653_v24 = vld [vmem:[%s947_s1 + $0x78] sm:$0xff] (!%p113_p2)  ;;  %v157_v26 = vld [vmem:[%s947_s1 + $0x28] sm:$0xff] (!%p113_p2)  ;;  %v158_v30 = vld [vmem:[%s947_s1 + $0x30] sm:$0xff] (!%p113_p2) }
   0xa   : > { %v159_v31 = vld [vmem:[%s947_s1 + $0x38] sm:$0xff] (!%p113_p2) }
   0xd   : > { %s950_s10 = smov (!%p134_p3, %s629_s10), 1 }
   0xe   : > { %s664_s11 = sshll.u32 %s950_s10, 6 }
   0xf   : > { %s138_s14 = scalar_lea.vmem %s946_s0, %s664_s11  ;;  %s143_s26 = scalar_lea.vmem %s948_s2, %s664_s11 }
  0x10   : > { %v144_v0 = vld [vmem:[%s138_s14] sm:$0xff]  ;;  %v145_v1 = vld [vmem:[%s138_s14 + $0x8] sm:$0xff]  ;;  %v146_v2 = vld [vmem:[%s138_s14 + $0x10] sm:$0xff] }
  0x11   : > { %v797_v3 = vpack.i.bf16 %v145_v1, %v144_v0  ;;  %v147_v4 = vld [vmem:[%s138_s14 + $0x18] sm:$0xff]  ;;  %v148_v5 = vld [vmem:[%s138_s14 + $0x20] sm:$0xff]  ;;  %v149_v6 = vld [vmem:[%s138_s14 + $0x28] sm:$0xff]  ;;  %v754_v27 = vpack.c.bf16 %v145_v1, %v144_v0 }
  0x12   : > { %v807_v7 = vpack.i.bf16 %v149_v6, %v148_v5  ;;  %v762_v8 = vpack.c.bf16 %v149_v6, %v148_v5  ;;  %v150_v9 = vld [vmem:[%s138_s14 + $0x30] sm:$0xff]  ;;  %v151_v10 = vld [vmem:[%s138_s14 + $0x38] sm:$0xff]  ;;  %v802_v11 = vpack.i.bf16 %v147_v4, %v146_v2  ;;  %v758_v28 = vpack.c.bf16 %v147_v4, %v146_v2 }
  0x13   : > { %798 = vrot.lane.b32.xlu0 %v797_v3, %s825_s15  ;;  %v812_v12 = vpack.i.bf16 %v151_v10, %v150_v9  ;;  %v766_v29 = vpack.c.bf16 %v151_v10, %v150_v9  ;;  %755 = vmatprep.subr.bf16.mxu0 %v754_v27 }
  0x14   : > { %808 = vrot.lane.b32.xlu1 %v807_v7, %s825_s15  ;;  %757 = vmatpush3.bf16.msra.mxu0 %v754_v27 }
  0x15   : > { %759 = vmatprep.subr.bf16.mxu0 %v758_v28 }
  0x17   : > { %803 = vrot.lane.b32.xlu0 %v802_v11, %s825_s15 }
  0x18   : > { %813 = vrot.lane.b32.xlu1 %v812_v12, %s825_s15  ;;  %761 = vmatpush3.bf16.msra.mxu0 %v758_v28 }
  0x19   : > { %763 = vmatprep.subr.bf16.mxu0 %v762_v8 }
  0x1c   : > { %765 = vmatpush3.bf16.msra.mxu0 %v762_v8 }
  0x1d   : > { %767 = vmatprep.subr.bf16.mxu0 %v766_v29 }
  0x20   : > { %769 = vmatpush3.bf16.msra.mxu0 %v766_v29 }
  0x35   : > { %331 = vxpose.xlu0.b32.start [1/8] (short) (narrow) %v646_v13, 64 }
  0x39   : > { %332 = vxpose.xlu0.b32.cont [2/8] (short) (narrow) %v647_v14, 64 }
  0x3d   : > { %333 = vxpose.xlu0.b32.cont [3/8] (short) (narrow) %v648_v15, 64 }
  0x41   : > { %334 = vxpose.xlu0.b32.cont [4/8] (short) (narrow) %v649_v16, 64  ;;  %160 = vxpose.xlu1.b32.start [1/8] (short) (narrow) %v152_v17, 64 }
  0x45   : > { %335 = vxpose.xlu0.b32.cont [5/8] (short) (narrow) %v650_v18, 64  ;;  %161 = vxpose.xlu1.b32.cont [2/8] (short) (narrow) %v153_v19, 64 }
  0x49   : > { %336 = vxpose.xlu0.b32.cont [6/8] (short) (narrow) %v651_v20, 64  ;;  %162 = vxpose.xlu1.b32.cont [3/8] (short) (narrow) %v154_v21, 64 }
  0x4d   : > { %337 = vxpose.xlu0.b32.cont [7/8] (short) (narrow) %v652_v22, 64  ;;  %163 = vxpose.xlu1.b32.cont [4/8] (short) (narrow) %v155_v23, 64 }
  0x51   : > { %338 = vxpose.xlu0.b32.end [8/8] (short) (narrow) %v653_v24, 64  ;;  %164 = vxpose.xlu1.b32.cont [5/8] (short) (narrow) %v156_v25, 64 }
  0x55   : > { %165 = vxpose.xlu1.b32.cont [6/8] (short) (narrow) %v157_v26, 64 }
  0x59   : > { %166 = vxpose.xlu1.b32.cont [7/8] (short) (narrow) %v158_v30, 64 }
  0x5d   : > { %167 = vxpose.xlu1.b32.end [8/8] (short) (narrow) %v159_v31, 64 }
  0x85   : > { %v799_v32 = vpop.permute.xlu0 %798 }
  0x86   : > { %v801_v33 = vunpack.i.h.bf16 %v799_v32  ;;  %v800_v34 = vunpack.i.l.bf16 %v799_v32  ;;  %v809_v35 = vpop.permute.xlu1 %808 }
  0x87   : > { %v811_v37 = vunpack.i.h.bf16 %v809_v35  ;;  %v810_v38 = vunpack.i.l.bf16 %v809_v35 }
  0x88   : > { %v770_v36 = vpack.c.bf16 %v801_v33, %v800_v34 }
  0x89   : > { %v804_v39 = vpop.permute.xlu0 %803  ;;  %v778_v44 = vpack.c.bf16 %v811_v37, %v810_v38 }
  0x8a   : > { %v806_v40 = vunpack.i.h.bf16 %v804_v39  ;;  %v805_v41 = vunpack.i.l.bf16 %v804_v39  ;;  %771 = vmatprep.subr.bf16.mxu1 %v770_v36  ;;  %v814_v42 = vpop.permute.xlu1 %813 }
  0x8b   : > { %773 = vmatpush3.bf16.msra.mxu1 %v770_v36  ;;  %v816_v45 = vunpack.i.h.bf16 %v814_v42  ;;  %v815_v46 = vunpack.i.l.bf16 %v814_v42 }
  0x8c   : > { %v774_v43 = vpack.c.bf16 %v806_v40, %v805_v41 }
  0x8d   : > { %v782_v47 = vpack.c.bf16 %v816_v45, %v815_v46 }
  0x8e   : > { %775 = vmatprep.subr.bf16.mxu1 %v774_v43 }
  0x8f   : > { %777 = vmatpush3.bf16.msra.mxu1 %v774_v43 }
  0x90   : > { %779 = vmatprep.subr.bf16.mxu1 %v778_v44 }
  0x93   : > { %781 = vmatpush3.bf16.msra.mxu1 %v778_v44 }
  0x94   : > { %783 = vmatprep.subr.bf16.mxu1 %v782_v47 }
  0x97   : > { %785 = vmatpush3.bf16.msra.mxu1 %v782_v47 }
  0xb5   : > { %v347_v48 = vpop.trf.xlu0 }
  0xb6   : > { %742 = vmatprep.mubr.msk.f32.mxu1 %vm192_vm0, %v347_v48 }
  0xb9   : > { %v348_v49 = vpop.trf.xlu0 }
  0xba   : > { %743 = vmatmul.mubr.msk.f32.vlgmr.msra.gmra.mrb[0].mxu1 %vm192_vm0, %v348_v49 }
  0xbd   : > { %v349_v50 = vpop.trf.xlu0 }
  0xbe   : > { %745 = vmatprep.mubr.msk.f32.mxu1 %vm192_vm0, %v349_v50 }
  0xc1   : > { %v350_v51 = vpop.trf.xlu0  ;;  %v176_v52 = vpop.trf.xlu1 }
  0xc2   : > { %746 = vmatmul.mubr.msk.f32.gmra.mrb[2].mxu1 %vm192_vm0, %v350_v51  ;;  %714 = vmatprep.mubr.msk.f32.mxu0 %vm192_vm0, %v176_v52 }
  0xc5   : > { %v351_v53 = vpop.trf.xlu0  ;;  %v177_v54 = vpop.trf.xlu1 }
  0xc6   : > { %748 = vmatprep.mubr.msk.f32.mxu1 %vm192_vm0, %v351_v53  ;;  %715 = vmatmul.mubr.msk.f32.vlgmr.msra.gmra.mrb[0].mxu0 %vm192_vm0, %v177_v54 }
  0xc9   : > { %v352_v55 = vpop.trf.xlu0  ;;  %v178_v56 = vpop.trf.xlu1 }
  0xca   : > { %749 = vmatmul.mubr.msk.f32.gmra.mrb[4].mxu1 %vm192_vm0, %v352_v55  ;;  %717 = vmatprep.mubr.msk.f32.mxu0 %vm192_vm0, %v178_v56 }
  0xcd   : > { %v353_v57 = vpop.trf.xlu0  ;;  %v179_v58 = vpop.trf.xlu1 }
  0xce   : > { %751 = vmatprep.mubr.msk.f32.mxu1 %vm192_vm0, %v353_v57  ;;  %718 = vmatmul.mubr.msk.f32.gmra.mrb[2].mxu0 %vm192_vm0, %v179_v58 }
  0xd1   : > { %v354_v59 = vpop.trf.xlu0  ;;  %v180_v60 = vpop.trf.xlu1 }
  0xd2   : > { %752 = vmatmul.mubr.msk.f32.gmra.mrb[6].mxu1 %vm192_vm0, %v354_v59  ;;  %720 = vmatprep.mubr.msk.f32.mxu0 %vm192_vm0, %v180_v60 }
  0xd5   : > { %v181_v61 = vpop.trf.xlu1 }
  0xd6   : > { %721 = vmatmul.mubr.msk.f32.gmra.mrb[4].mxu0 %vm192_vm0, %v181_v61 }
  0xd9   : > { %v182_v62 = vpop.trf.xlu1 }
  0xda   : > { %723 = vmatprep.mubr.msk.f32.mxu0 %vm192_vm0, %v182_v62 }
  0xdd   : > { %v183_v63 = vpop.trf.xlu1 }
  0xde   : > { %724 = vmatmul.mubr.msk.f32.gmra.mrb[6].mxu0 %vm192_vm0, %v183_v63 }
 0x18d   : > { %v744_v0 = vpop.f32.mrb[0].mxu1 }
 0x18e   : > { %534 = vrot.lane.b32.xlu1 %v744_v0, %s826_s23  ;;  %v485_v1 = vpop.f32.mrb[1].mxu1 }
 0x18f   : > { %532 = vrot.lane.b32.xlu0 %v485_v1, %s826_s23 }
 0x195   : > { %v747_v2 = vpop.f32.mrb[2].mxu1 }
 0x196   : > { %538 = vrot.lane.b32.xlu1 %v747_v2, %s826_s23  ;;  %v495_v3 = vpop.f32.mrb[3].mxu1 }
 0x197   : > { %536 = vrot.lane.b32.xlu0 %v495_v3, %s826_s23 }
 0x199   : > { %v716_v4 = vpop.f32.mrb[0].mxu0 }
 0x19a   : > { %v283_v5 = vpop.f32.mrb[1].mxu0 }
 0x19d   : > { %v750_v6 = vpop.f32.mrb[4].mxu1 }
 0x19e   : > { %542 = vrot.lane.b32.xlu1 %v750_v6, %s826_s23  ;;  %v505_v7 = vpop.f32.mrb[5].mxu1 }
 0x19f   : > { %540 = vrot.lane.b32.xlu0 %v505_v7, %s826_s23 }
 0x1a1   : > { %v719_v8 = vpop.f32.mrb[2].mxu0 }
 0x1a2   : > { %v293_v9 = vpop.f32.mrb[3].mxu0 }
 0x1a5   : > { %v753_v10 = vpop.f32.mrb[6].mxu1 }
 0x1a6   : > { %546 = vrot.lane.b32.xlu1 %v753_v10, %s826_s23  ;;  %v515_v11 = vpop.f32.mrb[7].mxu1 }
 0x1a7   : > { %544 = vrot.lane.b32.xlu0 %v515_v11, %s826_s23 }
 0x1a9   : > { %v722_v12 = vpop.f32.mrb[4].mxu0 }
 0x1aa   : > { %v303_v13 = vpop.f32.mrb[5].mxu0 }
 0x1b1   : > { %v725_v14 = vpop.f32.mrb[6].mxu0 }
 0x1b2   : > { %v313_v15 = vpop.f32.mrb[7].mxu0 }
 0x200   : > { %v535_v16 = vpop.permute.xlu1 %534 }
 0x201   : > { %v558_v17 = vsel %vm556_vm1, %v716_v4, %v535_v16  ;;  %v533_v18 = vpop.permute.xlu0 %532 }
 0x202   : > { %567 = vst.msk [vmem:[%s143_s26 + $0x8] sm:$0xff] %vm565_vm2, %v558_v17  ;;  %v557_v19 = vsel %vm556_vm1, %v283_v5, %v533_v18 }
 0x203   : > { %566 = vst.msk [vmem:[%s143_s26] sm:$0xff] %vm565_vm2, %v557_v19 }
 0x208   : > { %v539_v20 = vpop.permute.xlu1 %538 }
 0x209   : > { %v560_v21 = vsel %vm556_vm1, %v719_v8, %v539_v20  ;;  %v537_v22 = vpop.permute.xlu0 %536 }
 0x20a   : > { %569 = vst.msk [vmem:[%s143_s26 + $0x18] sm:$0xff] %vm565_vm2, %v560_v21  ;;  %v559_v23 = vsel %vm556_vm1, %v293_v9, %v537_v22 }
 0x20b   : > { %568 = vst.msk [vmem:[%s143_s26 + $0x10] sm:$0xff] %vm565_vm2, %v559_v23 }
 0x210   : > { %v543_v24 = vpop.permute.xlu1 %542 }
 0x211   : > { %v562_v25 = vsel %vm556_vm1, %v722_v12, %v543_v24  ;;  %v541_v26 = vpop.permute.xlu0 %540 }
 0x212   : > { %571 = vst.msk [vmem:[%s143_s26 + $0x28] sm:$0xff] %vm565_vm2, %v562_v25  ;;  %v561_v27 = vsel %vm556_vm1, %v303_v13, %v541_v26 }
 0x213   : > { %570 = vst.msk [vmem:[%s143_s26 + $0x20] sm:$0xff] %vm565_vm2, %v561_v27 }
 0x218   : > { %v547_v28 = vpop.permute.xlu1 %546 }
 0x219   : > { %v564_v29 = vsel %vm556_vm1, %v725_v14, %v547_v28  ;;  %v545_v30 = vpop.permute.xlu0 %544 }
 0x21a   : > { %573 = vst.msk [vmem:[%s143_s26 + $0x38] sm:$0xff] %vm565_vm2, %v564_v29  ;;  %v563_v31 = vsel %vm556_vm1, %v313_v15, %v545_v30 }
 0x21b   : > { %572 = vst.msk [vmem:[%s143_s26 + $0x30] sm:$0xff] %vm565_vm2, %v563_v31 }
 0x21c PF: > { %s12_s9 = sadd.s32 1, %s823_s9  }
 0x21d   : > { %p9_p4 = scmp.ge.s32.totalorder %s12_s9, 4  }
 0x21f   :  { %11 = sbr.rel (!%p9_p4) target bundleno = 1 (0x1), region = 59 }

</bundles_post_ra>
